<compile_context>
chip_gen: v7x
topology: tpu7x:2x2x1
jax: 0.10.0
libtpu: 0.0.40
codegen_flags: <defaults>
</compile_context>

<pallas_src>
from functools import partial

import jax
import jax.numpy as jnp
from jax.experimental import pallas as pl
from jax.experimental.pallas import tpu as pltpu


def _fused_head_kernel(x_ref, xt_ref, wx_ref, wt_ref, bc_ref, out_ref):
    """One row tile of the fused classifier.

    x_ref  : (tm, D)  image features (native dtype)
    xt_ref : (tm, D)  traffic features (native dtype)
    wx_ref : (D, 8)   softmax(weight1)[0] * [W1 ; W2]^T
    wt_ref : (D, 8)   softmax(weight1)[1] * [W1 ; W2]^T
    bc_ref : (1, 8)   [b1 ; b2]
    out_ref: (tm, 8)  [score1 | score2]
    """
    sx = jnp.dot(x_ref[...].astype(jnp.float32), wx_ref[...],
                 preferred_element_type=jnp.float32)
    st = jnp.dot(xt_ref[...].astype(jnp.float32), wt_ref[...],
                 preferred_element_type=jnp.float32)
    out_ref[...] = (sx + st + bc_ref[...]).astype(out_ref.dtype)


@partial(jax.jit, static_argnames=("tm",))
def classifier_withtraffic_forward(x, x_traffic, params, *, tm=1024):
    """x, x_traffic: (B, N, D) feature tensors. Returns (score1, score2)."""
    B, N, D = x.shape
    M = B * N

    xf = x.reshape(M, D)
    xtf = x_traffic.reshape(M, D)

    # Constant per-call work hoisted out of the kernel: F.softmax(weight1)
    # is folded directly into the fused (D, 8) head weights.
    w_sm = jax.nn.softmax(params["weight1"].astype(jnp.float32), axis=0)
    wc = jnp.concatenate(
        [params["cls1_w"].astype(jnp.float32),
         params["cls2_w"].astype(jnp.float32)], axis=0).T              # (D, 8)
    bc = jnp.concatenate(
        [params["cls1_b"].astype(jnp.float32),
         params["cls2_b"].astype(jnp.float32)], axis=0).reshape(1, -1)  # (1, 8)
    wx = w_sm[0] * wc                                                   # (D, 8)
    wt = w_sm[1] * wc                                                   # (D, 8)
    n_heads = wc.shape[1]  # 1 + 7 = 8

    # Row tile: big (kernel is HBM-bandwidth bound), clamped to the problem
    # size; zero-pad (a copy) only when M does not divide evenly.
    m_pad8 = ((M + 7) // 8) * 8
    tm_eff = max(8, min(tm, m_pad8))          # multiple of 8 by construction
    grid_m = (M + tm_eff - 1) // tm_eff
    m_pad = grid_m * tm_eff
    if m_pad != M:
        pad = ((0, m_pad - M), (0, 0))
        xf = jnp.pad(xf, pad)
        xtf = jnp.pad(xtf, pad)

    out = pl.pallas_call(
        _fused_head_kernel,
        out_shape=jax.ShapeDtypeStruct((m_pad, n_heads), jnp.float32),
        grid_spec=pltpu.PrefetchScalarGridSpec(
            num_scalar_prefetch=0,
            grid=(grid_m,),
            in_specs=[
                pl.BlockSpec((tm_eff, D),  lambda i: (i, 0)),  # x
                pl.BlockSpec((tm_eff, D),  lambda i: (i, 0)),  # x_traffic
                pl.BlockSpec((D, n_heads), lambda i: (0, 0)),  # w0 * [W1;W2]^T
                pl.BlockSpec((D, n_heads), lambda i: (0, 0)),  # w1 * [W1;W2]^T
                pl.BlockSpec((1, n_heads), lambda i: (0, 0)),  # fused bias
            ],
            out_specs=pl.BlockSpec((tm_eff, n_heads), lambda i: (i, 0)),
        ),
        compiler_params=pltpu.CompilerParams(
            dimension_semantics=("parallel",),
            # 2 inputs x 2 pipeline buffers x tm*D*4B (~12 MiB at tm=1024,
            # D=768) + small weights/outputs: above v5e's 16 MiB default
            # scoped limit, well below v7x's 64 MiB physical VMEM.
            vmem_limit_bytes=48 * 1024 * 1024,
        ),
    )(xf, xtf, wx, wt, bc)

    out = out[:M]
    score1 = out[:, 0:1].reshape(B, N, 1)
    score2 = out[:, 1:].reshape(B, N, 7)
    return score1, score2


def _reference_forward(x, x_traffic, params):
    """Plain-JAX reference reproducing the PyTorch semantics."""
    w = jax.nn.softmax(params["weight1"], axis=0)
    feat = w[0] * x + w[1] * x_traffic
    s1 = feat @ params["cls1_w"].T + params["cls1_b"]
    s2 = feat @ params["cls2_w"].T + params["cls2_b"]
    return s1, s2


if __name__ == "__main__":
    # Small synthetic shapes: batch=2, seq=8, embed_dim=32
    B, N, D = 2, 8, 32
    key = jax.random.PRNGKey(0)
    k_x, k_xt, k_w1, k_c1w, k_c1b, k_c2w, k_c2b = jax.random.split(key, 7)

    x = jax.random.normal(k_x, (B, N, D), dtype=jnp.float32)
    x_traffic = jax.random.normal(k_xt, (B, N, D), dtype=jnp.float32)

    params = {
        # nn.Parameter(torch.ones(2)) perturbed deterministically so the
        # softmax is non-trivial but still deterministic.
        "weight1": jnp.ones((2,), jnp.float32)
                   + 0.1 * jax.random.normal(k_w1, (2,), dtype=jnp.float32),
        "cls1_w": 0.05 * jax.random.normal(k_c1w, (1, D), dtype=jnp.float32),
        "cls1_b": 0.05 * jax.random.normal(k_c1b, (1,),   dtype=jnp.float32),
        "cls2_w": 0.05 * jax.random.normal(k_c2w, (7, D), dtype=jnp.float32),
        "cls2_b": 0.05 * jax.random.normal(k_c2b, (7,),   dtype=jnp.float32),
    }

    s1, s2 = classifier_withtraffic_forward(x, x_traffic, params)
    jax.block_until_ready((s1, s2))

    r1, r2 = _reference_forward(x, x_traffic, params)
    assert s1.shape == (B, N, 1) and s2.shape == (B, N, 7)
    assert jnp.allclose(s1, r1, atol=1e-5, rtol=1e-5)
    assert jnp.allclose(s2, r2, atol=1e-5, rtol=1e-5)

    print("KERNEL_OK")
</pallas_src>

<mosaic_0001>
module attributes {stable_mosaic.version = 11 : i64} {
  func.func @_fused_head_kernel(%arg0: i32, %arg1: memref<16x32xf32, #tpu.memory_space<vmem>>, %arg2: memref<16x32xf32, #tpu.memory_space<vmem>>, %arg3: memref<32x8xf32, #tpu.memory_space<vmem>>, %arg4: memref<32x8xf32, #tpu.memory_space<vmem>>, %arg5: memref<1x8xf32, #tpu.memory_space<vmem>>, %arg6: memref<16x8xf32, #tpu.memory_space<vmem>>) attributes {dimension_semantics = [#tpu.dimension_semantics<parallel>], iteration_bounds = array<i64: 1>, scalar_prefetch = 0 : i64, scratch_operands = 0 : i64, tpu.core_type = #tpu.core_type<tc>, window_params = [{transform_indices = @transform_0, window_bounds = array<i64: 16, 32>}, {transform_indices = @transform_1, window_bounds = array<i64: 16, 32>}, {pipeline_mode = #tpu.pipeline_mode<synchronous>, transform_indices = @transform_2, window_bounds = array<i64: 32, 8>}, {pipeline_mode = #tpu.pipeline_mode<synchronous>, transform_indices = @transform_3, window_bounds = array<i64: 32, 8>}, {pipeline_mode = #tpu.pipeline_mode<synchronous>, transform_indices = @transform_4, window_bounds = array<i64: 1, 8>}, {transform_indices = @transform_5, window_bounds = array<i64: 16, 8>}]} {
    %c0 = arith.constant 0 : index
    %c0_0 = arith.constant 0 : index
    %0 = vector.load %arg1[%c0, %c0_0] : memref<16x32xf32, #tpu.memory_space<vmem>>, vector<16x32xf32>
    %c0_1 = arith.constant 0 : index
    %c0_2 = arith.constant 0 : index
    %1 = vector.load %arg3[%c0_1, %c0_2] : memref<32x8xf32, #tpu.memory_space<vmem>>, vector<32x8xf32>
    %cst = arith.constant dense<0.000000e+00> : vector<16x8xf32>
    %2 = tpu.matmul %0, %1, %cst {dimension_numbers = #tpu.dot_dimension_numbers<[1], [0], [0], [1], [0, 0, 1, 1], [], []>} : vector<16x32xf32>, vector<32x8xf32>, vector<16x8xf32> -> vector<16x8xf32>
    %c0_3 = arith.constant 0 : index
    %c0_4 = arith.constant 0 : index
    %3 = vector.load %arg2[%c0_3, %c0_4] : memref<16x32xf32, #tpu.memory_space<vmem>>, vector<16x32xf32>
    %c0_5 = arith.constant 0 : index
    %c0_6 = arith.constant 0 : index
    %4 = vector.load %arg4[%c0_5, %c0_6] : memref<32x8xf32, #tpu.memory_space<vmem>>, vector<32x8xf32>
    %cst_7 = arith.constant dense<0.000000e+00> : vector<16x8xf32>
    %5 = tpu.matmul %3, %4, %cst_7 {dimension_numbers = #tpu.dot_dimension_numbers<[1], [0], [0], [1], [0, 0, 1, 1], [], []>} : vector<16x32xf32>, vector<32x8xf32>, vector<16x8xf32> -> vector<16x8xf32>
    %6 = arith.addf %2, %5 : vector<16x8xf32>
    %c0_8 = arith.constant 0 : index
    %c0_9 = arith.constant 0 : index
    %7 = vector.load %arg5[%c0_8, %c0_9] : memref<1x8xf32, #tpu.memory_space<vmem>>, vector<1x8xf32>
    %8 = vector.broadcast %7 : vector<1x8xf32> to vector<16x8xf32>
    %9 = arith.addf %6, %8 : vector<16x8xf32>
    %c0_10 = arith.constant 0 : index
    %c0_11 = arith.constant 0 : index
    %10 = vector.load %arg6[%c0_10, %c0_11] : memref<16x8xf32, #tpu.memory_space<vmem>>, vector<16x8xf32>
    tpu.vector_store %arg6[%c0_10, %c0_11], %9 {strides = array<i32>} : memref<16x8xf32, #tpu.memory_space<vmem>>, vector<16x8xf32>,
    return
  }
  func.func @transform_0(%arg0: i32) -> (i32, i32) {
    %c0_i32 = arith.constant 0 : i32
    %c0_i32_0 = arith.constant 0 : i32
    return %arg0, %c0_i32 : i32, i32
  }
  func.func @transform_1(%arg0: i32) -> (i32, i32) {
    %c0_i32 = arith.constant 0 : i32
    %c0_i32_0 = arith.constant 0 : i32
    return %arg0, %c0_i32 : i32, i32
  }
  func.func @transform_2(%arg0: i32) -> (i32, i32) {
    %c0_i32 = arith.constant 0 : i32
    %c0_i32_0 = arith.constant 0 : i32
    %c0_i32_1 = arith.constant 0 : i32
    return %c0_i32, %c0_i32_0 : i32, i32
  }
  func.func @transform_3(%arg0: i32) -> (i32, i32) {
    %c0_i32 = arith.constant 0 : i32
    %c0_i32_0 = arith.constant 0 : i32
    %c0_i32_1 = arith.constant 0 : i32
    return %c0_i32, %c0_i32_0 : i32, i32
  }
  func.func @transform_4(%arg0: i32) -> (i32, i32) {
    %c0_i32 = arith.constant 0 : i32
    %c0_i32_0 = arith.constant 0 : i32
    %c0_i32_1 = arith.constant 0 : i32
    return %c0_i32, %c0_i32_0 : i32, i32
  }
  func.func @transform_5(%arg0: i32) -> (i32, i32) {
    %c0_i32 = arith.constant 0 : i32
    %c0_i32_0 = arith.constant 0 : i32
    return %arg0, %c0_i32 : i32, i32
  }
}

</mosaic_0001>

<bundles_post_ra>
// kernel: classifier_withtraffic_forward.1
= control target key start
LH: loop header
LB: loop body
LE: loop exit
PB: predicated region body
PF: predicated region fallthrough
CT: control target
= control target key end

     0   :  { %vm32_vm0 = vcmask 261120   ;;  %vm204_vm1 = vcmask 64512   ;;  %s347_s3 = inlined_call_operand.vmem [shape: f32[32,8], index: 3, kind: input, shape index: {}]   ;;  %s348_s2 = inlined_call_operand.vmem [shape: f32[32,8], index: 2, kind: input, shape index: {}]   ;;  %s349_s1 = inlined_call_operand.vmem [shape: f32[16,32], index: 1, kind: input, shape index: {}]   ;;  %s350_s0 = inlined_call_operand.vmem [shape: f32[16,32], index: 0, kind: input, shape index: {}]   ;;  %s351_s4 = inlined_call_operand.vmem [shape: f32[1,8], index: 4, kind: input, shape index: {}]   ;;  %s352_s5 = inlined_call_operand.vmem [shape: f32[16,8], index: 5, kind: output, shape index: {}]  }
   0x1   :  { %v28_v0 = vld [vmem:[%s347_s3] sm:$0xff]  ;;  %v29_v1 = vld [vmem:[%s347_s3 + $0x8] sm:$0xff]  ;;  %v30_v5 = vld [vmem:[%s347_s3 + $0x10] sm:$0xff] }
   0x2   :  { %v22_v2 = vld [vmem:[%s348_s2] sm:$0xff]  ;;  %v250_v3 = vpack.c.bf16 %v29_v1, %v28_v0  ;;  %v23_v4 = vld [vmem:[%s348_s2 + $0x8] sm:$0xff]  ;;  %v31_v6 = vld [vmem:[%s347_s3 + $0x18] sm:$0xff] }
   0x3   :  { %v258_v7 = vpack.c.bf16 %v23_v4, %v22_v2  ;;  %v254_v8 = vpack.c.bf16 %v31_v6, %v30_v5  ;;  %v24_v9 = vld [vmem:[%s348_s2 + $0x10] sm:$0xff]  ;;  %v25_v10 = vld [vmem:[%s348_s2 + $0x18] sm:$0xff]  ;;  %v26_v11 = vld [vmem:[%s349_s1] sm:$0xff] }
   0x4   :  { %251 = vmatprep.subr.bf16.mxu1 %v250_v3  ;;  %v262_v12 = vpack.c.bf16 %v25_v10, %v24_v9  ;;  %236 = vmatprep.mubr.msk.f32.mxu1 %vm32_vm0, %v26_v11  ;;  %v20_v13 = vld [vmem:[%s350_s0] sm:$0xff]  ;;  %v27_v14 = vld [vmem:[%s349_s1 + $0x8] sm:$0xff] }
   0x5   :  { %259 = vmatprep.subr.bf16.mxu0 %v258_v7  ;;  %253 = vmatpush3.bf16.msra.mxu1 %v250_v3  ;;  %v21_v15 = vld [vmem:[%s350_s0 + $0x8] sm:$0xff]  ;;  %v215_v18 = vld [vmem:[%s351_s4] ss:$0 sm:$0xff] }
   0x6   :  { %261 = vmatpush3.bf16.msra.mxu0 %v258_v7  ;;  %255 = vmatprep.subr.bf16.mxu1 %v254_v8 }
   0x7   :  { %263 = vmatprep.subr.bf16.mxu0 %v262_v12  ;;  %247 = vmatprep.mubr.msk.f32.mxu0 %vm32_vm0, %v20_v13 }
   0x9   :  { %257 = vmatpush3.bf16.msra.mxu1 %v254_v8 }
   0xa   :  { %265 = vmatpush3.bf16.msra.mxu0 %v262_v12 }
   0xc   :  { %237 = vmatmul.mubr.msk.f32.vlgmr.msra.gmra.mrb[0].mxu1 %vm32_vm0, %v27_v14 }
   0xd   :  { %248 = vmatmul.mubr.msk.f32.vlgmr.msra.gmra.mrb[0].mxu0 %vm32_vm0, %v21_v15 }
  0xdf   :  { %v238_v16 = vpop.f32.mrb[0].mxu1 }
  0xe0   :  { %v249_v17 = vpop.f32.mrb[0].mxu0  ;;  %v105_v19 = vpop.f32.mrb[1].mxu1 }
  0xe1   :  { %v192_v20 = vadd.f32 %v249_v17, %v238_v16  ;;  %v186_v21 = vpop.f32.mrb[1].mxu0 }
  0xe2   :  { %v187_v22 = vadd.f32 %v186_v21, %v105_v19 }
  0xe3   :  { %v203_v23 = vadd.f32 %v215_v18, %v192_v20 }
  0xe4   :  { %v202_v24 = vadd.f32 %v215_v18, %v187_v22 }
  0xe5   :  { %206 = vst.msk [vmem:[%s352_s5 + $0x8] sm:$0xff] %vm204_vm1, %v203_v23 }
  0xe6   :  { %205 = vst.msk [vmem:[%s352_s5] sm:$0xff] %vm204_vm1, %v202_v24 }

</bundles_post_ra>
